<compile_context>
chip_gen: v6e
topology: v6e:2x2x1
jax: 0.10.0
libtpu: 0.0.40
codegen_flags: <defaults>
</compile_context>

<pallas_src>
import math
import functools

import jax
import jax.numpy as jnp
from jax import lax
from jax.experimental import pallas as pl
from jax.experimental.pallas import tpu as pltpu


# --------------------------------------------------------------------------
# helpers
# --------------------------------------------------------------------------
def _fast_recip(x):
    """EUP approximate reciprocal + one Newton refinement (~f32 accurate)."""
    r = pl.reciprocal(x, approx=True)
    return r * (2.0 - x * r)


# --------------------------------------------------------------------------
# Fused encoder kernel: N cross-attention layers + final LayerNorm
# --------------------------------------------------------------------------
def _encoder_kernel(x_ref, kv_ref, wq_ref, wk_ref, wv_ref, wo_ref, a_ref, b_ref, o_ref,
                    *, n_layers, batch_tile, lq, lkv, d_model, eps, unroll):
    Dp = x_ref.shape[-1]                      # lane-padded model dim (multiple of 128)
    w_dtype = wq_ref.dtype

    # Shared weights, loaded once per grid step.  Wq already carries the 1/sqrt(D)
    # softmax scale (folded on the host).
    wq = wq_ref[...]
    wk = wk_ref[...]
    wv = wv_ref[...]
    wo = wo_ref[...]

    # K/V are identical for every layer (clones() => identical weights, same kv input):
    # project once on the packed (bt*Lkv, Dp) slab, cast to weight dtype once.
    kv2 = kv_ref[...].astype(w_dtype)
    k2 = jnp.dot(kv2, wk, preferred_element_type=jnp.float32).astype(w_dtype)
    v2 = jnp.dot(kv2, wv, preferred_element_type=jnp.float32).astype(w_dtype)
    # Layout-preserving views for the batched attention matmuls (Lkv multiple of 8).
    k3 = k2.reshape(batch_tile, lkv, Dp)
    v3 = v2.reshape(batch_tile, lkv, Dp)

    # Residual stream carried across layers on-chip in f32 (padded lanes stay exactly 0).
    x0 = x_ref[...].astype(jnp.float32)       # (bt*Lq, Dp)

    def layer_body(_, x2):
        # q projection on the packed batch slab (big-M MXU pass, f32 accumulate)
        q2 = jnp.dot(x2.astype(w_dtype), wq, preferred_element_type=jnp.float32)
        q3 = q2.astype(w_dtype).reshape(batch_tile, lq, Dp)

        # scores = q k^T : one batched dot_general (batch dim 0, contract lanes)
        s = lax.dot_general(q3, k3,
                            dimension_numbers=(((2,), (2,)), ((0,), (0,))),
                            preferred_element_type=jnp.float32)       # (bt, Lq, Lkv)

        # numerically-stable softmax; divide -> EUP approximate reciprocal
        m = jnp.max(s, axis=-1, keepdims=True)
        e = jnp.exp(s - m)
        p = e * pl.reciprocal(jnp.sum(e, axis=-1, keepdims=True), approx=True)

        # context = p v : batched dot_general, then fold back to the packed slab
        ctx3 = lax.dot_general(p.astype(w_dtype), v3,
                               dimension_numbers=(((2,), (1,)), ((0,), (0,))),
                               preferred_element_type=jnp.float32)    # (bt, Lq, Dp)
        ctx2 = ctx3.reshape(batch_tile * lq, Dp)

        out2 = jnp.dot(ctx2.astype(w_dtype), wo, preferred_element_type=jnp.float32)
        return x2 + out2                                              # residual, f32

    x2 = lax.fori_loop(0, n_layers, layer_body, x0, unroll=unroll)

    # Final LayerNorm, fused into the same kernel.
    # Torch semantics: unbiased std (divisor D-1), (std + eps) denominator.
    # Statistics are taken over the real d_model lanes only; padded lanes of x2 are
    # exactly zero, so the plain lane-sum already equals the sum over real lanes.
    lane = lax.broadcasted_iota(jnp.int32, (1, Dp), 1)
    lane_mask = lane < d_model
    mean = jnp.sum(x2, axis=-1, keepdims=True) * (1.0 / d_model)
    c = jnp.where(lane_mask, x2 - mean, 0.0)
    var_unbiased = jnp.sum(c * c, axis=-1, keepdims=True) * (1.0 / (d_model - 1))
    inv_den = _fast_recip(jnp.sqrt(var_unbiased) + eps)
    y = a_ref[...] * (c * inv_den) + b_ref[...]       # padded lanes -> 0 (a_2/b_2 padded 0)
    o_ref[...] = y.astype(o_ref.dtype)


# --------------------------------------------------------------------------
# Wrapper (padding + pallas_call plumbing)
# --------------------------------------------------------------------------
def cross_attention_encoder(x, kv, params, n_layers, *, eps=1e-6, batch_tile=None):
    """x: (B, Lq, D), kv: (B, Lkv, D); returns (B, Lq, D)."""
    wq, wk, wv, wo, a2, b2 = params
    B, Lq, D = x.shape
    _, Lkv, _ = kv.shape

    LANE = 128
    Dp = ((D + LANE - 1) // LANE) * LANE
    pad = Dp - D

    # Host-side constant prep: fold 1/sqrt(D) into Wq; zero-pad everything to Dp lanes.
    scale = 1.0 / math.sqrt(D)
    wq_s = (wq.astype(jnp.float32) * scale).astype(wq.dtype)

    def pad_w(w):
        return jnp.pad(w, ((0, pad), (0, pad))) if pad else w

    wq_p, wk_p, wv_p, wo_p = pad_w(wq_s), pad_w(wk), pad_w(wv), pad_w(wo)
    a_p = jnp.pad(a2.reshape(1, D), ((0, 0), (0, pad))) if pad else a2.reshape(1, D)
    b_p = jnp.pad(b2.reshape(1, D), ((0, 0), (0, pad))) if pad else b2.reshape(1, D)
    x_p = jnp.pad(x, ((0, 0), (0, 0), (0, pad))) if pad else x
    kv_p = jnp.pad(kv, ((0, 0), (0, 0), (0, pad))) if pad else kv

    # batch_tile: default = one big block (best on single-TC v5e/v6e).
    # On v7x pass batch_tile=B//2 (or smaller) so grid=(n_bt,) with n_bt>=2 and the
    # "parallel" axis shards across both TensorCores (subject to its 64 MiB VMEM).
    if batch_tile is None:
        batch_tile = B
    assert B % batch_tile == 0, "batch_tile must divide B"
    n_bt = B // batch_tile
    if n_bt > 1:
        # non-full blocks must respect the (8,128) sublane rule for f32
        assert (batch_tile * Lq) % 8 == 0 and (batch_tile * Lkv) % 8 == 0, \
            "batch_tile*Lq and batch_tile*Lkv must be multiples of 8 when batch_tile < B"

    # Packed (rows, Dp) slabs: host reshapes are layout-preserving (row-major).
    x2 = x_p.reshape(B * Lq, Dp)
    kv2 = kv_p.reshape(B * Lkv, Dp)

    unroll = True if n_layers <= 8 else 2     # bound unroll for deep stacks

    kernel = functools.partial(
        _encoder_kernel, n_layers=n_layers, batch_tile=batch_tile,
        lq=Lq, lkv=Lkv, d_model=D, eps=eps, unroll=unroll)

    # Advisory cost estimate (padded dims = actual MXU work).
    flops = (2 * 2 * B * Lkv * Dp * Dp                                # hoisted k, v proj
             + n_layers * (2 * B * Lq * Dp * Dp                       # q projection
                           + 2 * 2 * B * Lq * Lkv * Dp                # scores + context
                           + 2 * B * Lq * Dp * Dp))                   # output projection
    transcendentals = n_layers * B * Lq * (Lkv + 1) + 3 * B * Lq
    itemsize = jnp.dtype(x.dtype).itemsize
    bytes_accessed = itemsize * (2 * B * Lq * Dp + B * Lkv * Dp + 4 * Dp * Dp + 2 * Dp)

    # Explicit scoped-VMEM budget: double-buffered I/O blocks + weights + on-chip
    # intermediates (residual, q/ctx/out, k2/v2, scores), with 2x headroom, capped so
    # it also fits v7x's 64 MiB physical VMEM.
    vmem_need = 4 * (2 * (2 * batch_tile * Lq * Dp + batch_tile * Lkv * Dp)
                     + 2 * (4 * Dp * Dp + 2 * Dp)
                     + 6 * batch_tile * Lq * Dp + 2 * batch_tile * Lkv * Dp
                     + 2 * batch_tile * Lq * Lkv)
    vmem_limit = int(min(max(2 * vmem_need, 4 << 20), 48 << 20))

    w_spec = pl.BlockSpec((Dp, Dp), lambda i: (0, 0))
    vec_spec = pl.BlockSpec((1, Dp), lambda i: (0, 0))

    out2 = pl.pallas_call(
        kernel,
        out_shape=jax.ShapeDtypeStruct((B * Lq, Dp), x.dtype),
        grid_spec=pltpu.PrefetchScalarGridSpec(
            num_scalar_prefetch=0,
            grid=(n_bt,),
            in_specs=[
                pl.BlockSpec((batch_tile * Lq, Dp), lambda i: (i, 0)),
                pl.BlockSpec((batch_tile * Lkv, Dp), lambda i: (i, 0)),
                w_spec, w_spec, w_spec, w_spec,
                vec_spec, vec_spec,
            ],
            out_specs=pl.BlockSpec((batch_tile * Lq, Dp), lambda i: (i, 0)),
        ),
        compiler_params=pltpu.CompilerParams(
            dimension_semantics=("parallel",),
            vmem_limit_bytes=vmem_limit),
        cost_estimate=pl.CostEstimate(
            flops=flops, transcendentals=transcendentals, bytes_accessed=bytes_accessed),
    )(x2, kv2, wq_p, wk_p, wv_p, wo_p, a_p, b_p)

    # Slice the zero padding back off and restore (B, Lq, D).
    return out2.reshape(B, Lq, Dp)[:, :, :D]

# TODO(synk): batch_tile is not auto-selected per chip generation (no portable core-count
# query here); on v7x call with batch_tile=B//2 to use both TensorCores.


# --------------------------------------------------------------------------
# Pure-JAX reference (mirrors the PyTorch forward) for a sanity check
# --------------------------------------------------------------------------
def _reference(x, kv, params, n_layers, eps=1e-6):
    wq, wk, wv, wo, a2, b2 = params
    x = x.astype(jnp.float32)
    kv = kv.astype(jnp.float32)
    d = x.shape[-1]
    for _ in range(n_layers):
        q = x @ wq
        k = kv @ wk
        v = kv @ wv
        s = jnp.einsum("bqd,bkd->bqk", q, k) / math.sqrt(d)
        p = jax.nn.softmax(s, axis=-1)
        out = jnp.einsum("bqk,bkd->bqd", p, v) @ wo
        x = x + out
    mean = x.mean(-1, keepdims=True)
    std = jnp.sqrt(((x - mean) ** 2).sum(-1, keepdims=True) / (d - 1))
    return a2 * (x - mean) / (std + eps) + b2


# --------------------------------------------------------------------------
if __name__ == "__main__":
    B, Lq, Lkv, D, N_LAYERS = 2, 8, 8, 32, 2

    key = jax.random.PRNGKey(0)
    kx, kkv, kq, kk, kv_, ko = jax.random.split(key, 6)

    x = jax.random.normal(kx, (B, Lq, D), dtype=jnp.float32)
    kv = jax.random.normal(kkv, (B, Lkv, D), dtype=jnp.float32)

    scale = 1.0 / math.sqrt(D)
    wq = jax.random.normal(kq, (D, D), dtype=jnp.float32) * scale
    wk = jax.random.normal(kk, (D, D), dtype=jnp.float32) * scale
    wv = jax.random.normal(kv_, (D, D), dtype=jnp.float32) * scale
    wo = jax.random.normal(ko, (D, D), dtype=jnp.float32) * scale
    a2 = jnp.ones((D,), dtype=jnp.float32)   # LayerNorm.a_2
    b2 = jnp.zeros((D,), dtype=jnp.float32)  # LayerNorm.b_2

    params = (wq, wk, wv, wo, a2, b2)

    out = cross_attention_encoder(x, kv, params, N_LAYERS)
    out = jax.block_until_ready(out)

    ref = _reference(x, kv, params, N_LAYERS)
    # tolerance leaves headroom for the EUP approximate reciprocal (softmax denom)
    # and MXU accumulation order
    assert jnp.allclose(out, ref, atol=2e-3, rtol=2e-3), (
        f"mismatch vs reference, max abs err = {float(jnp.max(jnp.abs(out - ref)))}")

    print("KERNEL_OK")
</pallas_src>

<mosaic_0001>
module attributes {stable_mosaic.version = 11 : i64} {
  func.func @_encoder_kernel(%arg0: i32, %arg1: memref<16x128xf32, #tpu.memory_space<vmem>>, %arg2: memref<16x128xf32, #tpu.memory_space<vmem>>, %arg3: memref<128x128xf32, #tpu.memory_space<vmem>>, %arg4: memref<128x128xf32, #tpu.memory_space<vmem>>, %arg5: memref<128x128xf32, #tpu.memory_space<vmem>>, %arg6: memref<128x128xf32, #tpu.memory_space<vmem>>, %arg7: memref<1x128xf32, #tpu.memory_space<vmem>>, %arg8: memref<1x128xf32, #tpu.memory_space<vmem>>, %arg9: memref<16x128xf32, #tpu.memory_space<vmem>>) attributes {dimension_semantics = [#tpu.dimension_semantics<parallel>], iteration_bounds = array<i64: 1>, scalar_prefetch = 0 : i64, scratch_operands = 0 : i64, tpu.core_type = #tpu.core_type<tc>, window_params = [{transform_indices = @transform_0, window_bounds = array<i64: 16, 128>}, {transform_indices = @transform_1, window_bounds = array<i64: 16, 128>}, {pipeline_mode = #tpu.pipeline_mode<synchronous>, transform_indices = @transform_2, window_bounds = array<i64: 128, 128>}, {pipeline_mode = #tpu.pipeline_mode<synchronous>, transform_indices = @transform_3, window_bounds = array<i64: 128, 128>}, {pipeline_mode = #tpu.pipeline_mode<synchronous>, transform_indices = @transform_4, window_bounds = array<i64: 128, 128>}, {pipeline_mode = #tpu.pipeline_mode<synchronous>, transform_indices = @transform_5, window_bounds = array<i64: 128, 128>}, {pipeline_mode = #tpu.pipeline_mode<synchronous>, transform_indices = @transform_6, window_bounds = array<i64: 1, 128>}, {pipeline_mode = #tpu.pipeline_mode<synchronous>, transform_indices = @transform_7, window_bounds = array<i64: 1, 128>}, {transform_indices = @transform_8, window_bounds = array<i64: 16, 128>}]} {
    %c0 = arith.constant 0 : index
    %c0_0 = arith.constant 0 : index
    %0 = vector.load %arg3[%c0, %c0_0] : memref<128x128xf32, #tpu.memory_space<vmem>>, vector<128x128xf32>
    %c0_1 = arith.constant 0 : index
    %c0_2 = arith.constant 0 : index
    %1 = vector.load %arg4[%c0_1, %c0_2] : memref<128x128xf32, #tpu.memory_space<vmem>>, vector<128x128xf32>
    %c0_3 = arith.constant 0 : index
    %c0_4 = arith.constant 0 : index
    %2 = vector.load %arg5[%c0_3, %c0_4] : memref<128x128xf32, #tpu.memory_space<vmem>>, vector<128x128xf32>
    %c0_5 = arith.constant 0 : index
    %c0_6 = arith.constant 0 : index
    %3 = vector.load %arg6[%c0_5, %c0_6] : memref<128x128xf32, #tpu.memory_space<vmem>>, vector<128x128xf32>
    %c0_7 = arith.constant 0 : index
    %c0_8 = arith.constant 0 : index
    %4 = vector.load %arg2[%c0_7, %c0_8] : memref<16x128xf32, #tpu.memory_space<vmem>>, vector<16x128xf32>
    %cst = arith.constant dense<0.000000e+00> : vector<16x128xf32>
    %5 = tpu.matmul %4, %1, %cst {dimension_numbers = #tpu.dot_dimension_numbers<[1], [0], [0], [1], [0, 0, 1, 1], [], []>} : vector<16x128xf32>, vector<128x128xf32>, vector<16x128xf32> -> vector<16x128xf32>
    %cst_9 = arith.constant dense<0.000000e+00> : vector<16x128xf32>
    %6 = tpu.matmul %4, %2, %cst_9 {dimension_numbers = #tpu.dot_dimension_numbers<[1], [0], [0], [1], [0, 0, 1, 1], [], []>} : vector<16x128xf32>, vector<128x128xf32>, vector<16x128xf32> -> vector<16x128xf32>
    %7 = vector.shape_cast %5 : vector<16x128xf32> to vector<2x8x128xf32>
    %8 = vector.shape_cast %6 : vector<16x128xf32> to vector<2x8x128xf32>
    %c0_10 = arith.constant 0 : index
    %c0_11 = arith.constant 0 : index
    %9 = vector.load %arg1[%c0_10, %c0_11] : memref<16x128xf32, #tpu.memory_space<vmem>>, vector<16x128xf32>
    %c0_i32 = arith.constant 0 : i32
    %cst_12 = arith.constant dense<0.000000e+00> : vector<16x128xf32>
    %10 = tpu.matmul %9, %0, %cst_12 {dimension_numbers = #tpu.dot_dimension_numbers<[1], [0], [0], [1], [0, 0, 1, 1], [], []>} : vector<16x128xf32>, vector<128x128xf32>, vector<16x128xf32> -> vector<16x128xf32>
    %11 = vector.shape_cast %10 : vector<16x128xf32> to vector<2x8x128xf32>
    %cst_13 = arith.constant dense<0.000000e+00> : vector<2x8x8xf32>
    %12 = tpu.matmul %11, %7, %cst_13 {dimension_numbers = #tpu.dot_dimension_numbers<[2], [2], [1], [1], [0, 0, 0, 1, 1, 1], [0], [0]>} : vector<2x8x128xf32>, vector<2x8x128xf32>, vector<2x8x8xf32> -> vector<2x8x8xf32>
    %cst_14 = arith.constant dense<0xFF800000> : vector<2x8xf32>
    %13 = vector.multi_reduction <maximumf>, %12, %cst_14 [2] : vector<2x8x8xf32> to vector<2x8xf32>
    %14 = vector.shape_cast %13 : vector<2x8xf32> to vector<2x8x1xf32>
    %15 = vector.broadcast %14 : vector<2x8x1xf32> to vector<2x8x8xf32>
    %16 = arith.subf %12, %15 : vector<2x8x8xf32>
    %17 = math.exp %16 : vector<2x8x8xf32>
    %cst_15 = arith.constant dense<0.000000e+00> : vector<2x8xf32>
    %18 = vector.multi_reduction <add>, %17, %cst_15 [2] : vector<2x8x8xf32> to vector<2x8xf32>
    %19 = vector.shape_cast %18 : vector<2x8xf32> to vector<2x8x1xf32>
    %20 = tpu.reciprocal %19 {approx = true} : vector<2x8x1xf32> -> vector<2x8x1xf32>
    %21 = vector.broadcast %20 : vector<2x8x1xf32> to vector<2x8x8xf32>
    %22 = arith.mulf %17, %21 : vector<2x8x8xf32>
    %cst_16 = arith.constant dense<0.000000e+00> : vector<2x8x128xf32>
    %23 = tpu.matmul %22, %8, %cst_16 {dimension_numbers = #tpu.dot_dimension_numbers<[2], [1], [1], [2], [0, 0, 0, 1, 1, 2], [0], [0]>} : vector<2x8x8xf32>, vector<2x8x128xf32>, vector<2x8x128xf32> -> vector<2x8x128xf32>
    %24 = vector.shape_cast %23 : vector<2x8x128xf32> to vector<16x128xf32>
    %cst_17 = arith.constant dense<0.000000e+00> : vector<16x128xf32>
    %25 = tpu.matmul %24, %3, %cst_17 {dimension_numbers = #tpu.dot_dimension_numbers<[1], [0], [0], [1], [0, 0, 1, 1], [], []>} : vector<16x128xf32>, vector<128x128xf32>, vector<16x128xf32> -> vector<16x128xf32>
    %26 = arith.addf %9, %25 : vector<16x128xf32>
    %c1_i32 = arith.constant 1 : i32
    %cst_18 = arith.constant dense<0.000000e+00> : vector<16x128xf32>
    %27 = tpu.matmul %26, %0, %cst_18 {dimension_numbers = #tpu.dot_dimension_numbers<[1], [0], [0], [1], [0, 0, 1, 1], [], []>} : vector<16x128xf32>, vector<128x128xf32>, vector<16x128xf32> -> vector<16x128xf32>
    %28 = vector.shape_cast %27 : vector<16x128xf32> to vector<2x8x128xf32>
    %cst_19 = arith.constant dense<0.000000e+00> : vector<2x8x8xf32>
    %29 = tpu.matmul %28, %7, %cst_19 {dimension_numbers = #tpu.dot_dimension_numbers<[2], [2], [1], [1], [0, 0, 0, 1, 1, 1], [0], [0]>} : vector<2x8x128xf32>, vector<2x8x128xf32>, vector<2x8x8xf32> -> vector<2x8x8xf32>
    %cst_20 = arith.constant dense<0xFF800000> : vector<2x8xf32>
    %30 = vector.multi_reduction <maximumf>, %29, %cst_20 [2] : vector<2x8x8xf32> to vector<2x8xf32>
    %31 = vector.shape_cast %30 : vector<2x8xf32> to vector<2x8x1xf32>
    %32 = vector.broadcast %31 : vector<2x8x1xf32> to vector<2x8x8xf32>
    %33 = arith.subf %29, %32 : vector<2x8x8xf32>
    %34 = math.exp %33 : vector<2x8x8xf32>
    %cst_21 = arith.constant dense<0.000000e+00> : vector<2x8xf32>
    %35 = vector.multi_reduction <add>, %34, %cst_21 [2] : vector<2x8x8xf32> to vector<2x8xf32>
    %36 = vector.shape_cast %35 : vector<2x8xf32> to vector<2x8x1xf32>
    %37 = tpu.reciprocal %36 {approx = true} : vector<2x8x1xf32> -> vector<2x8x1xf32>
    %38 = vector.broadcast %37 : vector<2x8x1xf32> to vector<2x8x8xf32>
    %39 = arith.mulf %34, %38 : vector<2x8x8xf32>
    %cst_22 = arith.constant dense<0.000000e+00> : vector<2x8x128xf32>
    %40 = tpu.matmul %39, %8, %cst_22 {dimension_numbers = #tpu.dot_dimension_numbers<[2], [1], [1], [2], [0, 0, 0, 1, 1, 2], [0], [0]>} : vector<2x8x8xf32>, vector<2x8x128xf32>, vector<2x8x128xf32> -> vector<2x8x128xf32>
    %41 = vector.shape_cast %40 : vector<2x8x128xf32> to vector<16x128xf32>
    %cst_23 = arith.constant dense<0.000000e+00> : vector<16x128xf32>
    %42 = tpu.matmul %41, %3, %cst_23 {dimension_numbers = #tpu.dot_dimension_numbers<[1], [0], [0], [1], [0, 0, 1, 1], [], []>} : vector<16x128xf32>, vector<128x128xf32>, vector<16x128xf32> -> vector<16x128xf32>
    %43 = arith.addf %26, %42 : vector<16x128xf32>
    %44 = tpu.iota {dimensions = array<i32: 1>} : vector<1x128xi32>
    %c32_i32 = arith.constant 32 : i32
    %45 = vector.broadcast %c32_i32 : i32 to vector<1x128xi32>
    %46 = arith.cmpi slt, %44, %45 : vector<1x128xi32>
    %cst_24 = arith.constant dense<0.000000e+00> : vector<16xf32>
    %47 = vector.multi_reduction <add>, %43, %cst_24 [1] : vector<16x128xf32> to vector<16xf32>
    %48 = vector.shape_cast %47 : vector<16xf32> to vector<16x1xf32>
    %cst_25 = arith.constant 3.125000e-02 : f32
    %49 = vector.broadcast %cst_25 : f32 to vector<16x1xf32>
    %50 = arith.mulf %48, %49 : vector<16x1xf32>
    %51 = vector.broadcast %50 : vector<16x1xf32> to vector<16x128xf32>
    %52 = arith.subf %43, %51 : vector<16x128xf32>
    %cst_26 = arith.constant 0.000000e+00 : f32
    %53 = vector.shape_cast %46 : vector<1x128xi1> to vector<1x128xi1>
    %54 = vector.broadcast %53 : vector<1x128xi1> to vector<16x128xi1>
    %55 = vector.broadcast %cst_26 : f32 to vector<16x128xf32>
    %56 = arith.select %54, %52, %55 : vector<16x128xi1>, vector<16x128xf32>
    %57 = arith.mulf %56, %56 : vector<16x128xf32>
    %cst_27 = arith.constant dense<0.000000e+00> : vector<16xf32>
    %58 = vector.multi_reduction <add>, %57, %cst_27 [1] : vector<16x128xf32> to vector<16xf32>
    %59 = vector.shape_cast %58 : vector<16xf32> to vector<16x1xf32>
    %cst_28 = arith.constant 0.0322580636 : f32
    %60 = vector.broadcast %cst_28 : f32 to vector<16x1xf32>
    %61 = arith.mulf %59, %60 : vector<16x1xf32>
    %62 = math.sqrt %61 : vector<16x1xf32>
    %cst_29 = arith.constant 9.99999997E-7 : f32
    %63 = vector.broadcast %cst_29 : f32 to vector<16x1xf32>
    %64 = arith.addf %62, %63 : vector<16x1xf32>
    %65 = tpu.reciprocal %64 {approx = true} : vector<16x1xf32> -> vector<16x1xf32>
    %66 = arith.mulf %64, %65 : vector<16x1xf32>
    %cst_30 = arith.constant 2.000000e+00 : f32
    %67 = vector.broadcast %cst_30 : f32 to vector<16x1xf32>
    %68 = arith.subf %67, %66 : vector<16x1xf32>
    %69 = arith.mulf %65, %68 : vector<16x1xf32>
    %c0_31 = arith.constant 0 : index
    %c0_32 = arith.constant 0 : index
    %70 = vector.load %arg7[%c0_31, %c0_32] : memref<1x128xf32, #tpu.memory_space<vmem>>, vector<1x128xf32>
    %71 = vector.broadcast %69 : vector<16x1xf32> to vector<16x128xf32>
    %72 = arith.mulf %56, %71 : vector<16x128xf32>
    %73 = vector.broadcast %70 : vector<1x128xf32> to vector<16x128xf32>
    %74 = arith.mulf %73, %72 : vector<16x128xf32>
    %c0_33 = arith.constant 0 : index
    %c0_34 = arith.constant 0 : index
    %75 = vector.load %arg8[%c0_33, %c0_34] : memref<1x128xf32, #tpu.memory_space<vmem>>, vector<1x128xf32>
    %76 = vector.broadcast %75 : vector<1x128xf32> to vector<16x128xf32>
    %77 = arith.addf %74, %76 : vector<16x128xf32>
    %c0_35 = arith.constant 0 : index
    %c0_36 = arith.constant 0 : index
    %78 = vector.load %arg9[%c0_35, %c0_36] : memref<16x128xf32, #tpu.memory_space<vmem>>, vector<16x128xf32>
    tpu.vector_store %arg9[%c0_35, %c0_36], %77 {strides = array<i32>} : memref<16x128xf32, #tpu.memory_space<vmem>>, vector<16x128xf32>,
    return
  }
  func.func @transform_0(%arg0: i32) -> (i32, i32) {
    %c0_i32 = arith.constant 0 : i32
    %c0_i32_0 = arith.constant 0 : i32
    return %arg0, %c0_i32 : i32, i32
  }
  func.func @transform_1(%arg0: i32) -> (i32, i32) {
    %c0_i32 = arith.constant 0 : i32
    %c0_i32_0 = arith.constant 0 : i32
    return %arg0, %c0_i32 : i32, i32
  }
  func.func @transform_2(%arg0: i32) -> (i32, i32) {
    %c0_i32 = arith.constant 0 : i32
    %c0_i32_0 = arith.constant 0 : i32
    %c0_i32_1 = arith.constant 0 : i32
    return %c0_i32, %c0_i32_0 : i32, i32
  }
  func.func @transform_3(%arg0: i32) -> (i32, i32) {
    %c0_i32 = arith.constant 0 : i32
    %c0_i32_0 = arith.constant 0 : i32
    %c0_i32_1 = arith.constant 0 : i32
    return %c0_i32, %c0_i32_0 : i32, i32
  }
  func.func @transform_4(%arg0: i32) -> (i32, i32) {
    %c0_i32 = arith.constant 0 : i32
    %c0_i32_0 = arith.constant 0 : i32
    %c0_i32_1 = arith.constant 0 : i32
    return %c0_i32, %c0_i32_0 : i32, i32
  }
  func.func @transform_5(%arg0: i32) -> (i32, i32) {
    %c0_i32 = arith.constant 0 : i32
    %c0_i32_0 = arith.constant 0 : i32
    %c0_i32_1 = arith.constant 0 : i32
    return %c0_i32, %c0_i32_0 : i32, i32
  }
  func.func @transform_6(%arg0: i32) -> (i32, i32) {
    %c0_i32 = arith.constant 0 : i32
    %c0_i32_0 = arith.constant 0 : i32
    %c0_i32_1 = arith.constant 0 : i32
    return %c0_i32, %c0_i32_0 : i32, i32
  }
  func.func @transform_7(%arg0: i32) -> (i32, i32) {
    %c0_i32 = arith.constant 0 : i32
    %c0_i32_0 = arith.constant 0 : i32
    %c0_i32_1 = arith.constant 0 : i32
    return %c0_i32, %c0_i32_0 : i32, i32
  }
  func.func @transform_8(%arg0: i32) -> (i32, i32) {
    %c0_i32 = arith.constant 0 : i32
    %c0_i32_0 = arith.constant 0 : i32
    return %arg0, %c0_i32 : i32, i32
  }
}

</mosaic_0001>

<bundles_post_ra>
// kernel: tpu_custom_call.1
= control target key start
LH: loop header
LB: loop body
LE: loop exit
PB: predicated region body
PF: predicated region fallthrough
CT: control target
= control target key end

     0   :  { %13 = vsyncpa [#allocation3], 0  ;;  %s2117_s0 = inlined_call_operand.hbm [shape: f32[16,128], index: 0, kind: input, shape index: {}]   ;;  %s2118_s1 = inlined_call_operand.hbm [shape: f32[16,128], index: 1, kind: input, shape index: {}]   ;;  %s2119_s2 = inlined_call_operand.hbm [shape: f32[128,128], index: 2, kind: input, shape index: {}]   ;;  %s2120_s3 = inlined_call_operand.hbm [shape: f32[128,128], index: 3, kind: input, shape index: {}]   ;;  %s2121_s4 = inlined_call_operand.hbm [shape: f32[128,128], index: 4, kind: input, shape index: {}]   ;;  %s2122_s5 = inlined_call_operand.hbm [shape: f32[128,128], index: 5, kind: input, shape index: {}]   ;;  %s2123_s6 = inlined_call_operand.vmem [shape: f32[1,128], index: 6, kind: input, shape index: {}]   ;;  %s2124_s7 = inlined_call_operand.vmem [shape: f32[1,128], index: 7, kind: input, shape index: {}]   ;;  %s2125_s8 = inlined_call_operand.hbm [shape: f32[16,128], index: 8, kind: output, shape index: {}]  }
   0x1   :  { %14 = vsyncpa [#allocation6], 0 }
   0x2   :  { %15 = vsyncpa [#allocation9], 0 }
   0x3   :  { %16 = vsyncpa [#allocation12], 0 }
   0x4   :  { %17 = vsyncpa [#allocation4], 0  ;;  %s1905_s27 = smov [#allocation5]   ;;  %s1906_s29 = smov [#allocation8]  }
   0x5   :  { %s35_s28 = sshll.u32 %s1905_s27, 4  ;;  %s59_s30 = sshll.u32 %s1906_s29, 4  ;;  %s36_s28 = int_to_ptr.vmem [resolvable:$true] %s35_s28  ;;  %s60_s30 = int_to_ptr.vmem [resolvable:$true] %s59_s30 }
   0x6   :  { %s1763_s9 = scalar_lea.vmem %s36_s28, 256  ;;  %p1768_p1 = scmp.lt.s32.totalorder %s36_s28, %s36_s28 }
   0x7   :  { %p1764_p0 = scmp.ne.s32.totalorder %s36_s28, %s1763_s9  ;;  %p1769_p2 = scmp.lt.s32.totalorder %s1763_s9, %s1763_s9 }
   0x9   :  { %p1770_p3 = por %p1769_p2, %p1768_p1 }
   0xb   :  { %p1771_p4 = pnand %p1770_p3, %p1764_p0 }
   0xd   :  { %1774 = shalt.err (!%p1771_p4)
}
   0xe   :  { %s1907_s10 = smov 128   ;;  %s1908_s11 = smov 8  }
   0xf   :  { %41 = dma.hbm_to_vmem [thread:$0]  %s2118_s1, 256, %s36_s28, [#allocation6], %s1907_s10, %s1907_s10, %s1908_s11  }
  0x10   :  { %s1783_s14 = scalar_lea.vmem %s60_s30, 2048  ;;  %p1788_p6 = scmp.lt.s32.totalorder %s60_s30, %s60_s30 }
  0x11   :  { %p1784_p5 = scmp.ne.s32.totalorder %s60_s30, %s1783_s14  ;;  %p1789_p7 = scmp.lt.s32.totalorder %s1783_s14, %s1783_s14 }
  0x13   :  { %p1790_p8 = por %p1789_p7, %p1788_p6 }
  0x15   :  { %p1791_p9 = pnand %p1790_p8, %p1784_p5 }
  0x17   :  { %1794 = shalt.err (!%p1791_p9)
}
  0x18   :  { %65 = dma.hbm_to_vmem [thread:$0]  %s2120_s3, 2048, %s60_s30, [#allocation9], %s1907_s10, %s1907_s10, %s1908_s11  }
  0x19   :  { %s1909_s17 = smov [#allocation2]   ;;  %s1910_s19 = smov [#allocation7]  }
  0x1a   :  { %s23_s18 = sshll.u32 %s1909_s17, 4  ;;  %s47_s20 = sshll.u32 %s1910_s19, 4  ;;  %s24_s18 = int_to_ptr.vmem [resolvable:$true] %s23_s18  ;;  %s48_s20 = int_to_ptr.vmem [resolvable:$true] %s47_s20 }
  0x1b   :  { %s1803_s1 = scalar_lea.vmem %s24_s18, 256  ;;  %p1808_p11 = scmp.lt.s32.totalorder %s24_s18, %s24_s18 }
  0x1c   :  { %p1804_p10 = scmp.ne.s32.totalorder %s24_s18, %s1803_s1  ;;  %p1809_p12 = scmp.lt.s32.totalorder %s1803_s1, %s1803_s1 }
  0x1e   :  { %p1810_p13 = por %p1809_p12, %p1808_p11 }
  0x20   :  { %p1811_p0 = pnand %p1810_p13, %p1804_p10 }
  0x22   :  { %1814 = shalt.err (!%p1811_p0)
}
  0x23   :  { %29 = dma.hbm_to_vmem [thread:$0]  %s2117_s0, 256, %s24_s18, [#allocation3], %s1907_s10, %s1907_s10, %s1908_s11  }
  0x24   :  { %s1823_s3 = scalar_lea.vmem %s48_s20, 2048  ;;  %p1828_p2 = scmp.lt.s32.totalorder %s48_s20, %s48_s20 }
  0x25   :  { %p1824_p1 = scmp.ne.s32.totalorder %s48_s20, %s1823_s3  ;;  %p1829_p3 = scmp.lt.s32.totalorder %s1823_s3, %s1823_s3 }
  0x27   :  { %p1830_p4 = por %p1829_p3, %p1828_p2 }
  0x29   :  { %p1831_p5 = pnand %p1830_p4, %p1824_p1 }
  0x2b   :  { %1834 = shalt.err (!%p1831_p5)
}
  0x2c   :  { %53 = dma.hbm_to_vmem [thread:$0]  %s2119_s2, 2048, %s48_s20, [#allocation6], %s1907_s10, %s1907_s10, %s1908_s11  }
  0x2d   :  { %s1911_s25 = smov [#allocation10]   ;;  %s1912_s27 = smov [#allocation11]  }
  0x2e   :  { %s71_s26 = sshll.u32 %s1911_s25, 4  ;;  %s83_s28 = sshll.u32 %s1912_s27, 4  ;;  %s72_s26 = int_to_ptr.vmem [resolvable:$true] %s71_s26  ;;  %s84_s28 = int_to_ptr.vmem [resolvable:$true] %s83_s28 }
  0x2f   :  { %s1843_s0 = scalar_lea.vmem %s72_s26, 2048  ;;  %p1848_p7 = scmp.lt.s32.totalorder %s72_s26, %s72_s26 }
  0x30   :  { %p1844_p6 = scmp.ne.s32.totalorder %s72_s26, %s1843_s0  ;;  %p1849_p8 = scmp.lt.s32.totalorder %s1843_s0, %s1843_s0 }
  0x32   :  { %p1850_p9 = por %p1849_p8, %p1848_p7 }
  0x34   :  { %p1851_p10 = pnand %p1850_p9, %p1844_p6 }
  0x36   :  { %1854 = shalt.err (!%p1851_p10)
}
  0x37   :  { %77 = dma.hbm_to_vmem [thread:$0]  %s2121_s4, 2048, %s72_s26, [#allocation9], %s1907_s10, %s1907_s10, %s1908_s11  }
  0x38   :  { %s1863_s2 = scalar_lea.vmem %s84_s28, 2048  ;;  %p1868_p12 = scmp.lt.s32.totalorder %s84_s28, %s84_s28 }
  0x39   :  { %p1864_p11 = scmp.ne.s32.totalorder %s84_s28, %s1863_s2  ;;  %p1869_p13 = scmp.lt.s32.totalorder %s1863_s2, %s1863_s2 }
  0x3b   :  { %p1870_p0 = por %p1869_p13, %p1868_p12 }
  0x3d   :  { %p1871_p1 = pnand %p1870_p0, %p1864_p11 }
  0x3f   :  { %1874 = shalt.err (!%p1871_p1)
}
  0x40   :  { %89 = dma.hbm_to_vmem [thread:$0]  %s2122_s5, 2048, %s84_s28, [#allocation12], %s1907_s10, %s1907_s10, %s1908_s11  }
  0x41   :  { %1895 = dma.done.wait [#allocation3], 256  }
  0x42   :  { %1896 = vsyncadd [#allocation3], 4294967040 }
  0x43   :  { %1897 = dma.done.wait [#allocation6], 2304  }
  0x44   :  { %1898 = vsyncadd [#allocation6], 4294964992 }
  0x45   :  { %1899 = dma.done.wait [#allocation9], 4096  }
  0x46   :  { %1900 = vsyncadd [#allocation9], 4294963200 }
  0x47   :  { %1901 = dma.done.wait [#allocation12], 2048  }
  0x48   :  { %1902 = vsyncadd [#allocation12], 4294965248  ;;  %v143_v0 = vld [vmem:[#allocation8 + $0x78] sm:$0xff]  ;;  %v142_v1 = vld [vmem:[#allocation8 + $0x70] sm:$0xff]  ;;  %v1913_v52 = vmov 0.0   ;;  %vm1914_vm0 = vmmov 0  }
  0x49   :  { %1470 = vmatprep.subr.mxu0 %v143_v0  ;;  %v141_v2 = vld [vmem:[#allocation8 + $0x68] sm:$0xff]  ;;  %v140_v3 = vld [vmem:[#allocation8 + $0x60] sm:$0xff]  ;;  %v176_v4 = vld [vmem:[#allocation5] sm:$0xff]  ;;  %vm545_vm1 = vcmask 64512   ;;  %s1915_s15 = smov [#allocation13]  }
  0x4a   :  { %1471 = vmatpush3.msra.mxu0 %v143_v0  ;;  %v139_v5 = vld [vmem:[#allocation8 + $0x58] sm:$0xff]  ;;  %1502 = vmatprep.mubr.f32.mxu0 %v176_v4  ;;  %v138_v6 = vld [vmem:[#allocation8 + $0x50] sm:$0xff]  ;;  %v137_v7 = vld [vmem:[#allocation8 + $0x48] sm:$0xff]  ;;  %s1325_s16 = sshll.u32 %s1915_s15, 4  ;;  %s1326_s16 = int_to_ptr.vmem [resolvable:$true] %s1325_s16 }
  0x4b   :  { %1472 = vmatprep.subr.mxu0 %v142_v1  ;;  %1537 = vmatprep.mubr.f32.mxu1 %v176_v4  ;;  %v136_v8 = vld [vmem:[#allocation8 + $0x40] sm:$0xff]  ;;  %v159_v9 = vld [vmem:[#allocation10 + $0x78] sm:$0xff]  ;;  %v158_v10 = vld [vmem:[#allocation10 + $0x70] sm:$0xff]  ;;  %s1875_s17 = scalar_lea.vmem %s1326_s16, 256  ;;  %p1880_p3 = scmp.lt.s32.totalorder %s1326_s16, %s1326_s16 }
  0x4c   :  { %1473 = vmatpush3.msra.mxu0 %v142_v1  ;;  %1505 = vmatprep.subr.mxu1 %v159_v9  ;;  %v135_v11 = vld [vmem:[#allocation8 + $0x38] sm:$0xff]  ;;  %v157_v12 = vld [vmem:[#allocation10 + $0x68] sm:$0xff]  ;;  %v134_v13 = vld [vmem:[#allocation8 + $0x30] sm:$0xff]  ;;  %p1876_p2 = scmp.ne.s32.totalorder %s1326_s16, %s1875_s17  ;;  %p1881_p4 = scmp.lt.s32.totalorder %s1875_s17, %s1875_s17 }
  0x4d   :  { %1474 = vmatprep.subr.mxu0 %v141_v2  ;;  %1506 = vmatpush3.msra.mxu1 %v159_v9  ;;  %v156_v14 = vld [vmem:[#allocation10 + $0x60] sm:$0xff]  ;;  %v133_v15 = vld [vmem:[#allocation8 + $0x28] sm:$0xff]  ;;  %v155_v16 = vld [vmem:[#allocation10 + $0x58] sm:$0xff] }
  0x4e   :  { %1475 = vmatpush3.msra.mxu0 %v141_v2  ;;  %1507 = vmatprep.subr.mxu1 %v158_v10  ;;  %v132_v17 = vld [vmem:[#allocation8 + $0x20] sm:$0xff]  ;;  %v154_v18 = vld [vmem:[#allocation10 + $0x50] sm:$0xff]  ;;  %v131_v19 = vld [vmem:[#allocation8 + $0x18] sm:$0xff]  ;;  %p1882_p5 = por %p1881_p4, %p1880_p3 }
  0x4f   :  { %1476 = vmatprep.subr.mxu0 %v140_v3  ;;  %1508 = vmatpush3.msra.mxu1 %v158_v10  ;;  %v153_v20 = vld [vmem:[#allocation10 + $0x48] sm:$0xff]  ;;  %v130_v21 = vld [vmem:[#allocation8 + $0x10] sm:$0xff]  ;;  %v152_v22 = vld [vmem:[#allocation10 + $0x40] sm:$0xff] }
  0x50   :  { %1477 = vmatpush3.msra.mxu0 %v140_v3  ;;  %1509 = vmatprep.subr.mxu1 %v157_v12  ;;  %v129_v23 = vld [vmem:[#allocation8 + $0x8] sm:$0xff]  ;;  %v151_v24 = vld [vmem:[#allocation10 + $0x38] sm:$0xff]  ;;  %v128_v25 = vld [vmem:[#allocation8] sm:$0xff]  ;;  %p1883_p6 = pnand %p1882_p5, %p1876_p2 }
  0x51   :  { %1478 = vmatprep.subr.mxu0 %v139_v5  ;;  %1510 = vmatpush3.msra.mxu1 %v157_v12  ;;  %v150_v26 = vld [vmem:[#allocation10 + $0x30] sm:$0xff]  ;;  %v1997_v27 = vld [vmem:[#allocation5 + $0x8] sm:$0xff]  ;;  %v2001_v29 = vld [vmem:[#allocation2] sm:$0xff] }
  0x52   :  { %1479 = vmatpush3.msra.mxu0 %v139_v5  ;;  %1511 = vmatprep.subr.mxu1 %v156_v14  ;;  %v1999_v28 = vld [vmem:[#allocation7 + $0x78] sm:$0xff]  ;;  %v2003_v30 = vld [vmem:[#allocation7 + $0x70] sm:$0xff]  ;;  %v149_v31 = vld [vmem:[#allocation10 + $0x28] sm:$0xff] }
  0x53   :  { %1480 = vmatprep.subr.mxu0 %v138_v6  ;;  %1512 = vmatpush3.msra.mxu1 %v156_v14  ;;  %v2008_v32 = vld [vmem:[#allocation7 + $0x68] sm:$0xff]  ;;  %v148_v33 = vld [vmem:[#allocation10 + $0x20] sm:$0xff]  ;;  %v147_v35 = vld [vmem:[#allocation10 + $0x18] sm:$0xff] }
  0x54   :  { %1481 = vmatpush3.msra.mxu0 %v138_v6  ;;  %1513 = vmatprep.subr.mxu1 %v155_v16  ;;  %v124_v34 = vld [vmem:[#allocation7 + $0x60] sm:$0xff]  ;;  %v123_v36 = vld [vmem:[#allocation7 + $0x58] sm:$0xff]  ;;  %v146_v37 = vld [vmem:[#allocation10 + $0x10] sm:$0xff] }
  0x55   :  { %1482 = vmatprep.subr.mxu0 %v137_v7  ;;  %1514 = vmatpush3.msra.mxu1 %v155_v16  ;;  %v122_v38 = vld [vmem:[#allocation7 + $0x50] sm:$0xff]  ;;  %v145_v39 = vld [vmem:[#allocation10 + $0x8] sm:$0xff]  ;;  %v120_v41 = vld [vmem:[#allocation7 + $0x40] sm:$0xff] }
  0x56   :  { %1483 = vmatpush3.msra.mxu0 %v137_v7  ;;  %1515 = vmatprep.subr.mxu1 %v154_v18  ;;  %v121_v40 = vld [vmem:[#allocation7 + $0x48] sm:$0xff]  ;;  %v119_v42 = vld [vmem:[#allocation7 + $0x38] sm:$0xff]  ;;  %v118_v43 = vld [vmem:[#allocation7 + $0x30] sm:$0xff] }
  0x57   :  { %1484 = vmatprep.subr.mxu0 %v136_v8  ;;  %1516 = vmatpush3.msra.mxu1 %v154_v18  ;;  %v117_v44 = vld [vmem:[#allocation7 + $0x28] sm:$0xff]  ;;  %v116_v45 = vld [vmem:[#allocation7 + $0x20] sm:$0xff]  ;;  %v115_v46 = vld [vmem:[#allocation7 + $0x18] sm:$0xff] }
  0x58   :  { %1485 = vmatpush3.msra.mxu0 %v136_v8  ;;  %1517 = vmatprep.subr.mxu1 %v153_v20  ;;  %v114_v47 = vld [vmem:[#allocation7 + $0x10] sm:$0xff]  ;;  %v113_v48 = vld [vmem:[#allocation7 + $0x8] sm:$0xff]  ;;  %v112_v49 = vld [vmem:[#allocation7] sm:$0xff] }
  0x59   :  { %1486 = vmatprep.subr.mxu0 %v135_v11  ;;  %1518 = vmatpush3.msra.mxu1 %v153_v20  ;;  %v2015_v50 = vld [vmem:[#allocation2 + $0x8] sm:$0xff]  ;;  %v144_v51 = vld [vmem:[#allocation10] sm:$0xff]  ;;  %v2058_v18 = vld [vmem:[#allocation11 + $0x70] sm:$0xff] }
  0x5a   :  { %1487 = vmatpush3.msra.mxu0 %v135_v11  ;;  %1519 = vmatprep.subr.mxu1 %v152_v22  ;;  %v2050_v11 = vld [vmem:[#allocation11 + $0x78] sm:$0xff]  ;;  %v172_v20 = vld [vmem:[#allocation11 + $0x60] sm:$0xff] }
  0x5b   :  { %1488 = vmatprep.subr.mxu0 %v134_v13  ;;  %1520 = vmatpush3.msra.mxu1 %v152_v22  ;;  %v170_v22 = vld [vmem:[#allocation11 + $0x50] sm:$0xff] }
  0x5c   :  { %1489 = vmatpush3.msra.mxu0 %v134_v13  ;;  %1521 = vmatprep.subr.mxu1 %v151_v24 }
  0x5d   :  { %1490 = vmatprep.subr.mxu0 %v133_v15  ;;  %1522 = vmatpush3.msra.mxu1 %v151_v24  ;;  %v168_v24 = vld [vmem:[#allocation11 + $0x40] sm:$0xff] }
  0x5e   :  { %1491 = vmatpush3.msra.mxu0 %v133_v15  ;;  %1523 = vmatprep.subr.mxu1 %v150_v26 }
  0x5f   :  { %1492 = vmatprep.subr.mxu0 %v132_v17  ;;  %1524 = vmatpush3.msra.mxu1 %v150_v26  ;;  %v166_v26 = vld [vmem:[#allocation11 + $0x30] sm:$0xff] }
  0x60   :  { %1493 = vmatpush3.msra.mxu0 %v132_v17  ;;  %1525 = vmatprep.subr.mxu1 %v149_v31 }
  0x61   :  { %1494 = vmatprep.subr.mxu0 %v131_v19  ;;  %1526 = vmatpush3.msra.mxu1 %v149_v31  ;;  %v162_v31 = vld [vmem:[#allocation11 + $0x10] sm:$0xff] }
  0x62   :  { %1495 = vmatpush3.msra.mxu0 %v131_v19  ;;  %1527 = vmatprep.subr.mxu1 %v148_v33  ;;  %v2062_v19 = vld [vmem:[#allocation11 + $0x68] sm:$0xff] }
  0x63   :  { %1496 = vmatprep.subr.mxu0 %v130_v21  ;;  %1528 = vmatpush3.msra.mxu1 %v148_v33  ;;  %v160_v33 = vld [vmem:[#allocation11] sm:$0xff] }
  0x64   :  { %1497 = vmatpush3.msra.mxu0 %v130_v21  ;;  %1529 = vmatprep.subr.mxu1 %v147_v35  ;;  %v171_v21 = vld [vmem:[#allocation11 + $0x58] sm:$0xff] }
  0x65   :  { %1498 = vmatprep.subr.mxu0 %v129_v23  ;;  %1530 = vmatpush3.msra.mxu1 %v147_v35 }
  0x66   :  { %1499 = vmatpush3.msra.mxu0 %v129_v23  ;;  %1531 = vmatprep.subr.mxu1 %v146_v37  ;;  %v169_v23 = vld [vmem:[#allocation11 + $0x48] sm:$0xff] }
  0x67   :  { %1500 = vmatprep.subr.mxu0 %v128_v25  ;;  %1532 = vmatpush3.msra.mxu1 %v146_v37 }
  0x68   :  { %1501 = vmatpush3.msra.mxu0 %v128_v25  ;;  %1533 = vmatprep.subr.mxu1 %v145_v39  ;;  %v167_v25 = vld [vmem:[#allocation11 + $0x38] sm:$0xff] }
  0x69   :  { %1503 = vmatmul.mubr.f32.vlgmr.msra.gmra.mxu0 %v1997_v27  ;;  %1540 = vmatprep.subr.mxu0 %v1999_v28 }
  0x6a   :  { %1541 = vmatpush3.msra.mxu0 %v1999_v28  ;;  %1572 = vmatprep.mubr.f32.mxu0 %v2001_v29 }
  0x6b   :  { %1542 = vmatprep.subr.mxu0 %v2003_v30  ;;  %1534 = vmatpush3.msra.mxu1 %v145_v39 }
  0x6c   :  { %1543 = vmatpush3.msra.mxu0 %v2003_v30  ;;  %1535 = vmatprep.subr.mxu1 %v144_v51 }
  0x6d   :  { %1544 = vmatprep.subr.mxu0 %v2008_v32  ;;  %1536 = vmatpush3.msra.mxu1 %v144_v51 }
  0x6e   :  { %1545 = vmatpush3.msra.mxu0 %v2008_v32  ;;  %1575 = vmatprep.subr.mxu1 %v1913_v52 }
  0x6f   :  { %1546 = vmatprep.subr.mxu0 %v124_v34  ;;  %1538 = vmatmul.mubr.f32.vlgmr.msra.gmra.mxu1 %v1997_v27  ;;  %v165_v27 = vld [vmem:[#allocation11 + $0x28] sm:$0xff] }
  0x70   :  { %1547 = vmatpush3.msra.mxu0 %v124_v34  ;;  %1577 = vmatprep.mubr.msk.f32.mxu1 %vm1914_vm0, %v1913_v52 }
  0x71   :  { %1548 = vmatprep.subr.mxu0 %v123_v36 }
  0x72   :  { %1549 = vmatpush3.msra.mxu0 %v123_v36 }
  0x73   :  { %1550 = vmatprep.subr.mxu0 %v122_v38 }
  0x74   :  { %1551 = vmatpush3.msra.mxu0 %v122_v38 }
  0x75   :  { %1552 = vmatprep.subr.mxu0 %v121_v40 }
  0x76   :  { %1553 = vmatpush3.msra.mxu0 %v121_v40 }
  0x77   :  { %1554 = vmatprep.subr.mxu0 %v120_v41 }
  0x78   :  { %1555 = vmatpush3.msra.mxu0 %v120_v41 }
  0x79   :  { %1556 = vmatprep.subr.mxu0 %v119_v42 }
  0x7a   :  { %1557 = vmatpush3.msra.mxu0 %v119_v42 }
  0x7b   :  { %1558 = vmatprep.subr.mxu0 %v118_v43 }
  0x7c   :  { %1559 = vmatpush3.msra.mxu0 %v118_v43 }
  0x7d   :  { %1560 = vmatprep.subr.mxu0 %v117_v44 }
  0x7e   :  { %1561 = vmatpush3.msra.mxu0 %v117_v44 }
  0x7f   :  { %1562 = vmatprep.subr.mxu0 %v116_v45 }
  0x80   :  { %1563 = vmatpush3.msra.mxu0 %v116_v45 }
  0x81   :  { %1564 = vmatprep.subr.mxu0 %v115_v46 }
  0x82   :  { %1565 = vmatpush3.msra.mxu0 %v115_v46 }
  0x83   :  { %1566 = vmatprep.subr.mxu0 %v114_v47 }
  0x84   :  { %1567 = vmatpush3.msra.mxu0 %v114_v47 }
  0x85   :  { %1568 = vmatprep.subr.mxu0 %v113_v48 }
  0x86   :  { %1569 = vmatpush3.msra.mxu0 %v113_v48 }
  0x87   :  { %1570 = vmatprep.subr.mxu0 %v112_v49 }
  0x88   :  { %1571 = vmatpush3.msra.mxu0 %v112_v49 }
  0x89   :  { %1573 = vmatmul.mubr.f32.vlgmr.msra.gmra.mxu0 %v2015_v50  ;;  %1630 = vmatprep.subr.mxu0 %v1999_v28 }
  0x8a   :  { %1631 = vmatpush3.msra.mxu0 %v1999_v28  ;;  %v164_v28 = vld [vmem:[#allocation11 + $0x20] sm:$0xff] }
  0x8b   :  { %1632 = vmatprep.subr.mxu0 %v2003_v30 }
  0x8c   :  { %1633 = vmatpush3.msra.mxu0 %v2003_v30  ;;  %v163_v30 = vld [vmem:[#allocation11 + $0x18] sm:$0xff] }
  0x8d   :  { %1634 = vmatprep.subr.mxu0 %v2008_v32 }
  0x8e   :  { %1635 = vmatpush3.msra.mxu0 %v2008_v32  ;;  %v161_v32 = vld [vmem:[#allocation11 + $0x8] sm:$0xff] }
  0x8f   :  { %1636 = vmatprep.subr.mxu0 %v124_v34 }
  0x90   :  { %1637 = vmatpush3.msra.mxu0 %v124_v34 }
  0x91   :  { %1638 = vmatprep.subr.mxu0 %v123_v36 }
  0x92   :  { %1639 = vmatpush3.msra.mxu0 %v123_v36 }
  0x93   :  { %1640 = vmatprep.subr.mxu0 %v122_v38 }
  0x94   :  { %1641 = vmatpush3.msra.mxu0 %v122_v38 }
  0x95   :  { %1642 = vmatprep.subr.mxu0 %v121_v40 }
  0x96   :  { %1643 = vmatpush3.msra.mxu0 %v121_v40 }
  0x97   :  { %1644 = vmatprep.subr.mxu0 %v120_v41 }
  0x98   :  { %1645 = vmatpush3.msra.mxu0 %v120_v41 }
  0x99   :  { %1646 = vmatprep.subr.mxu0 %v119_v42 }
  0x9a   :  { %1647 = vmatpush3.msra.mxu0 %v119_v42 }
  0x9b   :  { %1648 = vmatprep.subr.mxu0 %v118_v43 }
  0x9c   :  { %1649 = vmatpush3.msra.mxu0 %v118_v43 }
  0x9d   :  { %1650 = vmatprep.subr.mxu0 %v117_v44 }
  0x9e   :  { %1651 = vmatpush3.msra.mxu0 %v117_v44 }
  0x9f   :  { %1652 = vmatprep.subr.mxu0 %v116_v45 }
  0xa0   :  { %1653 = vmatpush3.msra.mxu0 %v116_v45 }
  0xa1   :  { %1654 = vmatprep.subr.mxu0 %v115_v46 }
  0xa2   :  { %1655 = vmatpush3.msra.mxu0 %v115_v46 }
  0xa3   :  { %1656 = vmatprep.subr.mxu0 %v114_v47 }
  0xa4   :  { %1657 = vmatpush3.msra.mxu0 %v114_v47 }
  0xa5   :  { %1658 = vmatprep.subr.mxu0 %v113_v48 }
  0xa6   :  { %1659 = vmatpush3.msra.mxu0 %v113_v48 }
  0xa7   :  { %1660 = vmatprep.subr.mxu0 %v112_v49 }
  0xa8   :  { %1661 = vmatpush3.msra.mxu0 %v112_v49 }
  0xa9   :  { %1685 = vmatprep.subr.mxu0 %v2050_v11 }
 0x129   :  { %v2028_v53 = vpop.f32.mrf.mxu0 }
 0x12b   :  { %v2030_v54 = vpop.f32.mrf.mxu0 }
 0x12c   :  { %1576 = vmatpush3.xpose.msra.mxu1 %v2030_v54 }
 0x12d   :  { %1580 = vmatprep.subr.mxu1 %v1913_v52 }
 0x12f   :  { %v2040_v57 = vpop.f32.mrf.mxu1 }
 0x131   :  { %v2042_v58 = vpop.f32.mrf.mxu1 }
 0x149   :  { %v1574_v55 = vpop.f32.mrf.mxu0 }
 0x14b   :  { %v396_v56 = vpop.f32.mrf.mxu0 }
 0x14c   :  { %1578 = vmatmul.mubr.f32.vlgmr.msra.gmra.mxu1 %v396_v56 }
 0x14d   :  { %1581 = vmatpush3.xpose.msra.mxu1 %v2028_v53  ;;  %1582 = vmatprep.mubr.msk.f32.mxu1 %vm1914_vm0, %v1913_v52 }
 0x14e   :  { %1585 = vmatprep.subr.mxu1 %v1913_v52 }
 0x150   :  { %1583 = vmatmul.mubr.f32.vlgmr.msra.gmra.mxu1 %v1574_v55 }
 0x151   :  { %1587 = vmatprep.mubr.msk.f32.mxu1 %vm1914_vm0, %v1913_v52  ;;  %1586 = vmatpush3.msra.mxu1 %v2042_v58 }
 0x152   :  { %1590 = vmatprep.subr.mxu1 %v1913_v52 }
 0x20c   :  { %v471_v59 = vpop.f32.mrf.mxu1 }
 0x20d   :  { %v546_v60 = vsel %vm545_vm1, %v471_v59, -inf }
 0x20e   :  { %547 = vmax.xlane.f32.xlu0 %v546_v60  ;;  %v1579_v61 = vpop.f32.mrf.mxu1 }
 0x210   :  { %v541_v62 = vpop.f32.mrf.mxu1 }
 0x211   :  { %v549_v63 = vsel %vm545_vm1, %v541_v62, -inf }
 0x212   :  { %550 = vmax.xlane.f32.xlu0 %v549_v63  ;;  %v1584_v0 = vpop.f32.mrf.mxu1 }
 0x297   :  { %v548_v1 = vpop.xlane.xlu0 %547 }
 0x298   :  { %v552_v2 = vsub.f32 %v471_v59, %v548_v1 }
 0x29a   :  { %v554_v3 = vmul.f32 1.442695, %v552_v2 }
 0x29b   :  { %v551_v4 = vpop.xlane.xlu0 %550 }
 0x29c   :  { %1731 = vpow2.f32 %v554_v3  ;;  %v553_v5 = vsub.f32 %v541_v62, %v551_v4 }
 0x29e   :  { %v556_v6 = vmul.f32 1.442695, %v553_v5 }
 0x2a0   :  { %1733 = vpow2.f32 %v556_v6 }
 0x2a9   :  { %v1732_v7 = vpop.eup %1731 }
 0x2aa   :  { %v558_v8 = vsel %vm545_vm1, %v1732_v7, 0.0 }
 0x2ab   :  { %559 = vadd.xlane.f32.xlu1 %v558_v8 }
 0x2ad   :  { %v1734_v9 = vpop.eup %1733 }
 0x2ae   :  { %v561_v10 = vsel %vm545_vm1, %v1734_v9, 0.0 }
 0x2af   :  { %562 = vadd.xlane.f32.xlu1 %v561_v10 }
 0x334   :  { %v560_v12 = vpop.xlane.xlu1 %559 }
 0x335   :  { %1735 = vrcp.f32 %v560_v12 }
 0x338   :  { %v563_v13 = vpop.xlane.xlu1 %562 }
 0x339   :  { %1737 = vrcp.f32 %v563_v13 }
 0x342   :  { %v1736_v14 = vpop.eup %1735 }
 0x343   :  { %v566_v15 = vmul.f32 %v1736_v14, %v1732_v7 }
 0x345   :  { %1588 = vmatmul.mubr.msk.f32.vlgmr.msra.gmra.mxu1 %vm545_vm1, %v566_v15 }
 0x346   :  { %v1738_v16 = vpop.eup %1737  ;;  %1591 = vmatpush3.msra.mxu1 %v2040_v57  ;;  %1592 = vmatprep.mubr.msk.f32.mxu1 %vm1914_vm0, %v1913_v52 }
 0x347   :  { %v567_v17 = vmul.f32 %v1738_v16, %v1734_v9  ;;  %1595 = vmatprep.subr.mxu1 %v2050_v11 }
 0x349   :  { %1593 = vmatmul.mubr.msk.f32.vlgmr.msra.gmra.mxu1 %vm545_vm1, %v567_v17 }
 0x34a   :  { %1596 = vmatpush3.msra.mxu1 %v2050_v11 }
 0x34b   :  { %1597 = vmatprep.subr.mxu1 %v2058_v18 }
 0x34c   :  { %1598 = vmatpush3.msra.mxu1 %v2058_v18 }
 0x34d   :  { %1599 = vmatprep.subr.mxu1 %v2062_v19 }
 0x34e   :  { %1600 = vmatpush3.msra.mxu1 %v2062_v19 }
 0x34f   :  { %1601 = vmatprep.subr.mxu1 %v172_v20 }
 0x350   :  { %1602 = vmatpush3.msra.mxu1 %v172_v20 }
 0x351   :  { %1603 = vmatprep.subr.mxu1 %v171_v21 }
 0x352   :  { %1604 = vmatpush3.msra.mxu1 %v171_v21 }
 0x353   :  { %1605 = vmatprep.subr.mxu1 %v170_v22 }
 0x354   :  { %1606 = vmatpush3.msra.mxu1 %v170_v22 }
 0x355   :  { %1607 = vmatprep.subr.mxu1 %v169_v23 }
 0x356   :  { %1608 = vmatpush3.msra.mxu1 %v169_v23 }
 0x357   :  { %1609 = vmatprep.subr.mxu1 %v168_v24 }
 0x358   :  { %1610 = vmatpush3.msra.mxu1 %v168_v24 }
 0x359   :  { %1611 = vmatprep.subr.mxu1 %v167_v25 }
 0x35a   :  { %1612 = vmatpush3.msra.mxu1 %v167_v25 }
 0x35b   :  { %1613 = vmatprep.subr.mxu1 %v166_v26 }
 0x35c   :  { %1614 = vmatpush3.msra.mxu1 %v166_v26 }
 0x35d   :  { %1615 = vmatprep.subr.mxu1 %v165_v27 }
 0x35e   :  { %1616 = vmatpush3.msra.mxu1 %v165_v27 }
 0x35f   :  { %1617 = vmatprep.subr.mxu1 %v164_v28 }
 0x360   :  { %1618 = vmatpush3.msra.mxu1 %v164_v28 }
 0x361   :  { %1619 = vmatprep.subr.mxu1 %v163_v30 }
 0x362   :  { %1620 = vmatpush3.msra.mxu1 %v163_v30 }
 0x363   :  { %1621 = vmatprep.subr.mxu1 %v162_v31 }
 0x364   :  { %1622 = vmatpush3.msra.mxu1 %v162_v31 }
 0x365   :  { %1623 = vmatprep.subr.mxu1 %v161_v32 }
 0x366   :  { %1624 = vmatpush3.msra.mxu1 %v161_v32 }
 0x367   :  { %1625 = vmatprep.subr.mxu1 %v160_v33 }
 0x368   :  { %1626 = vmatpush3.msra.mxu1 %v160_v33 }
 0x369   :  { %1665 = vmatprep.subr.mxu1 %v1913_v52 }
 0x405   :  { %v637_v34 = vpop.f32.mrf.mxu1 }
 0x406   :  { %1627 = vmatprep.mubr.f32.mxu1 %v637_v34 }
 0x407   :  { %v1589_v35 = vpop.f32.mrf.mxu1 }
 0x409   :  { %v710_v36 = vpop.f32.mrf.mxu1 }
 0x40a   :  { %1628 = vmatmul.mubr.f32.vlgmr.msra.gmra.mxu1 %v710_v36 }
 0x40b   :  { %1666 = vmatpush3.xpose.msra.mxu1 %v2030_v54  ;;  %v1594_v37 = vpop.f32.mrf.mxu1  ;;  %1667 = vmatprep.mubr.msk.f32.mxu1 %vm1914_vm0, %v1913_v52 }
 0x40c   :  { %1670 = vmatprep.subr.mxu1 %v1913_v52 }
 0x4ca   :  { %v1629_v38 = vpop.f32.mrf.mxu1 }
 0x4cb   :  { %v2077_v41 = vadd.f32 %v1629_v38, %v2015_v50 }
 0x4cc   :  { %v780_v39 = vpop.f32.mrf.mxu1 }
 0x4cd   :  { %v2074_v40 = vadd.f32 %v780_v39, %v2001_v29 }
 0x4cf   :  { %1662 = vmatprep.mubr.f32.mxu0 %v2074_v40 }
 0x4d0   :  { %1663 = vmatmul.mubr.f32.vlgmr.msra.gmra.mxu0 %v2077_v41 }
 0x4d1   :  { %1686 = vmatpush3.msra.mxu0 %v2050_v11 }
 0x4d2   :  { %1687 = vmatprep.subr.mxu0 %v2058_v18 }
 0x4d3   :  { %1688 = vmatpush3.msra.mxu0 %v2058_v18 }
 0x4d4   :  { %1689 = vmatprep.subr.mxu0 %v2062_v19 }
 0x4d5   :  { %1690 = vmatpush3.msra.mxu0 %v2062_v19 }
 0x4d6   :  { %1691 = vmatprep.subr.mxu0 %v172_v20 }
 0x4d7   :  { %1692 = vmatpush3.msra.mxu0 %v172_v20 }
 0x4d8   :  { %1693 = vmatprep.subr.mxu0 %v171_v21 }
 0x4d9   :  { %1694 = vmatpush3.msra.mxu0 %v171_v21 }
 0x4da   :  { %1695 = vmatprep.subr.mxu0 %v170_v22 }
 0x4db   :  { %1696 = vmatpush3.msra.mxu0 %v170_v22 }
 0x4dc   :  { %1697 = vmatprep.subr.mxu0 %v169_v23 }
 0x4dd   :  { %1698 = vmatpush3.msra.mxu0 %v169_v23 }
 0x4de   :  { %1699 = vmatprep.subr.mxu0 %v168_v24 }
 0x4df   :  { %1700 = vmatpush3.msra.mxu0 %v168_v24 }
 0x4e0   :  { %1701 = vmatprep.subr.mxu0 %v167_v25 }
 0x4e1   :  { %1702 = vmatpush3.msra.mxu0 %v167_v25 }
 0x4e2   :  { %1703 = vmatprep.subr.mxu0 %v166_v26 }
 0x4e3   :  { %1704 = vmatpush3.msra.mxu0 %v166_v26 }
 0x4e4   :  { %1705 = vmatprep.subr.mxu0 %v165_v27 }
 0x4e5   :  { %1706 = vmatpush3.msra.mxu0 %v165_v27 }
 0x4e6   :  { %1707 = vmatprep.subr.mxu0 %v164_v28 }
 0x4e7   :  { %1708 = vmatpush3.msra.mxu0 %v164_v28 }
 0x4e8   :  { %1709 = vmatprep.subr.mxu0 %v163_v30 }
 0x4e9   :  { %1710 = vmatpush3.msra.mxu0 %v163_v30 }
 0x4ea   :  { %1711 = vmatprep.subr.mxu0 %v162_v31 }
 0x4eb   :  { %1712 = vmatpush3.msra.mxu0 %v162_v31 }
 0x4ec   :  { %1713 = vmatprep.subr.mxu0 %v161_v32 }
 0x4ed   :  { %1714 = vmatpush3.msra.mxu0 %v161_v32 }
 0x4ee   :  { %1715 = vmatprep.subr.mxu0 %v160_v33 }
 0x4ef   :  { %1716 = vmatpush3.msra.mxu0 %v160_v33 }
 0x590   :  { %v1664_v29 = vpop.f32.mrf.mxu0 }
 0x592   :  { %v857_v42 = vpop.f32.mrf.mxu0 }
 0x593   :  { %1668 = vmatmul.mubr.f32.vlgmr.msra.gmra.mxu1 %v857_v42 }
 0x594   :  { %1671 = vmatpush3.xpose.msra.mxu1 %v2028_v53  ;;  %1672 = vmatprep.mubr.msk.f32.mxu1 %vm1914_vm0, %v1913_v52 }
 0x595   :  { %1675 = vmatprep.subr.mxu1 %v1913_v52 }
 0x597   :  { %1673 = vmatmul.mubr.f32.vlgmr.msra.gmra.mxu1 %v1664_v29 }
 0x598   :  { %1676 = vmatpush3.msra.mxu1 %v2042_v58  ;;  %1677 = vmatprep.mubr.msk.f32.mxu1 %vm1914_vm0, %v1913_v52 }
 0x599   :  { %1680 = vmatprep.subr.mxu1 %v1913_v52 }
 0x653   :  { %v932_v43 = vpop.f32.mrf.mxu1 }
 0x654   :  { %v1006_v44 = vsel %vm545_vm1, %v932_v43, -inf }
 0x655   :  { %1007 = vmax.xlane.f32.xlu0 %v1006_v44  ;;  %v1669_v45 = vpop.f32.mrf.mxu1  ;;  %v1344_v44 = vld [vmem:[%s2123_s6] ss:$0 sm:$0xff] }
 0x657   :  { %v1002_v46 = vpop.f32.mrf.mxu1 }
 0x658   :  { %v1009_v47 = vsel %vm545_vm1, %v1002_v46, -inf }
 0x659   :  { %1010 = vmax.xlane.f32.xlu1 %v1009_v47  ;;  %v1674_v48 = vpop.f32.mrf.mxu1  ;;  %v1345_v47 = vld [vmem:[%s2124_s7] ss:$0 sm:$0xff] }
 0x6de   :  { %v1008_v49 = vpop.xlane.xlu0 %1007 }
 0x6df   :  { %v1012_v50 = vsub.f32 %v932_v43, %v1008_v49 }
 0x6e1   :  { %v1014_v51 = vmul.f32 1.442695, %v1012_v50 }
 0x6e2   :  { %v1011_v53 = vpop.xlane.xlu1 %1010 }
 0x6e3   :  { %1739 = vpow2.f32 %v1014_v51  ;;  %v1013_v54 = vsub.f32 %v1002_v46, %v1011_v53 }
 0x6e5   :  { %v1016_v55 = vmul.f32 1.442695, %v1013_v54 }
 0x6e7   :  { %1741 = vpow2.f32 %v1016_v55 }
 0x6f0   :  { %v1740_v56 = vpop.eup %1739 }
 0x6f1   :  { %v1018_v58 = vsel %vm545_vm1, %v1740_v56, 0.0 }
 0x6f2   :  { %1019 = vadd.xlane.f32.xlu0 %v1018_v58 }
 0x6f4   :  { %v1742_v59 = vpop.eup %1741 }
 0x6f5   :  { %v1021_v60 = vsel %vm545_vm1, %v1742_v59, 0.0 }
 0x6f6   :  { %1022 = vadd.xlane.f32.xlu1 %v1021_v60 }
 0x77b   :  { %v1020_v61 = vpop.xlane.xlu0 %1019 }
 0x77c   :  { %1743 = vrcp.f32 %v1020_v61 }
 0x77f   :  { %v1023_v62 = vpop.xlane.xlu1 %1022 }
 0x780   :  { %1745 = vrcp.f32 %v1023_v62 }
 0x789   :  { %v1744_v63 = vpop.eup %1743 }
 0x78a   :  { %v1026_v0 = vmul.f32 %v1744_v63, %v1740_v56 }
 0x78c   :  { %1678 = vmatmul.mubr.msk.f32.vlgmr.msra.gmra.mxu1 %vm545_vm1, %v1026_v0 }
 0x78d   :  { %v1746_v1 = vpop.eup %1745  ;;  %1681 = vmatpush3.msra.mxu1 %v2040_v57  ;;  %1682 = vmatprep.mubr.msk.f32.mxu1 %vm1914_vm0, %v1913_v52  ;;  %v1251_v57 = vlaneseq }
 0x78e   :  { %v1027_v2 = vmul.f32 %v1746_v1, %v1742_v59 }
 0x78f   :  { %v1252_v11 = vand.u32 127, %v1251_v57 }
 0x790   :  { %1683 = vmatmul.mubr.msk.f32.vlgmr.msra.gmra.mxu1 %vm545_vm1, %v1027_v2 }
 0x791   :  { %vm1253_vm2 = vcmp.lt.s32.totalorder %v1252_v11, 32 }
 0x84c   :  { %v1097_v3 = vpop.f32.mrf.mxu1 }
 0x84d   :  { %1717 = vmatprep.mubr.f32.mxu0 %v1097_v3 }
 0x84e   :  { %v1679_v4 = vpop.f32.mrf.mxu1 }
 0x850   :  { %v1170_v5 = vpop.f32.mrf.mxu1 }
 0x851   :  { %1718 = vmatmul.mubr.f32.vlgmr.msra.gmra.mxu0 %v1170_v5 }
 0x852   :  { %v1684_v6 = vpop.f32.mrf.mxu1 }
 0x911   :  { %v1719_v7 = vpop.f32.mrf.mxu0 }
 0x912   :  { %v1250_v8 = vadd.f32 %v1719_v7, %v2077_v41 }
 0x913   :  { %v1240_v9 = vpop.f32.mrf.mxu0 }
 0x914   :  { %v1249_v10 = vadd.f32 %v1240_v9, %v2074_v40  ;;  %1256 = vadd.xlane.f32.xlu1 %v1250_v8 }
 0x916   :  { %1254 = vadd.xlane.f32.xlu0 %v1249_v10 }
 0x99d   :  { %v1257_v52 = vpop.xlane.xlu1 %1256 }
 0x99e   :  { %v1259_v12 = vmul.f32 0.03125, %v1257_v52 }
 0x99f   :  { %v1255_v13 = vpop.xlane.xlu0 %1254 }
 0x9a0   :  { %v1261_v14 = vsub.f32 %v1250_v8, %v1259_v12  ;;  %v1258_v15 = vmul.f32 0.03125, %v1255_v13 }
 0x9a2   :  { %v1260_v16 = vsub.f32 %v1249_v10, %v1258_v15  ;;  %v1265_v17 = vsel %vm1253_vm2, %v1261_v14, 0.0 }
 0x9a3   :  { %v1267_v18 = vmul.f32 %v1265_v17, %v1265_v17 }
 0x9a4   :  { %v1264_v19 = vsel %vm1253_vm2, %v1260_v16, 0.0 }
 0x9a5   :  { %1270 = vadd.xlane.f32.xlu1 %v1267_v18  ;;  %v1266_v20 = vmul.f32 %v1264_v19, %v1264_v19 }
 0x9a7   :  { %1268 = vadd.xlane.f32.xlu0 %v1266_v20 }
 0xa2e   :  { %v1271_v21 = vpop.xlane.xlu1 %1270 }
 0xa2f   :  { %v1273_v22 = vmul.f32 0.032258064, %v1271_v21 }
 0xa30   :  { %v1269_v23 = vpop.xlane.xlu0 %1268 }
 0xa31   :  { %1747 = vrsqrt.f32 %v1273_v22  ;;  %v1272_v24 = vmul.f32 0.032258064, %v1269_v23  ;;  %vm1283_vm3 = vcmp.eq.f32.partialorder %v1273_v22, inf  ;;  %v1286_v27 = vand.u32 2147483648, %v1273_v22 }
 0xa32   :  { %vm1285_vm4 = vcmp.eq.f32.partialorder %v1273_v22, 0.0 }
 0xa33   :  { %1749 = vrsqrt.f32 %v1272_v24  ;;  %vm1276_vm5 = vcmp.eq.f32.partialorder %v1272_v24, inf  ;;  %v1279_v33 = vand.u32 2147483648, %v1272_v24  ;;  %vm1278_vm6 = vcmp.eq.f32.partialorder %v1272_v24, 0.0 }
 0xa3e   :  { %v1748_v25 = vpop.eup %1747 }
 0xa3f   :  { %v1282_v26 = vmul.f32 %v1748_v25, %v1273_v22 }
 0xa40   :  { %v1750_v28 = vpop.eup %1749 }
 0xa41   :  { %v1284_v30 = vsel %vm1283_vm3, %v1273_v22, %v1282_v26  ;;  %v1275_v31 = vmul.f32 %v1750_v28, %v1272_v24 }
 0xa42   :  { %v1287_v32 = vsel %vm1285_vm4, %v1286_v27, %v1284_v30 }
 0xa43   :  { %v1289_v34 = vadd.f32 1e-06, %v1287_v32  ;;  %v1277_v35 = vsel %vm1276_vm5, %v1272_v24, %v1275_v31 }
 0xa44   :  { %v1280_v36 = vsel %vm1278_vm6, %v1279_v33, %v1277_v35 }
 0xa45   :  { %1751 = vrcp.f32 %v1289_v34  ;;  %v1288_v37 = vadd.f32 1e-06, %v1280_v36 }
 0xa47   :  { %1753 = vrcp.f32 %v1288_v37 }
 0xa52   :  { %v1752_v38 = vpop.eup %1751 }
 0xa53   :  { %v1293_v39 = vmul.f32 %v1752_v38, %v1289_v34 }
 0xa54   :  { %v1754_v40 = vpop.eup %1753 }
 0xa55   :  { %v1295_v41 = vsub.f32 2.0, %v1293_v39  ;;  %v1292_v29 = vmul.f32 %v1754_v40, %v1288_v37 }
 0xa57   :  { %v1297_v42 = vmul.f32 %v1752_v38, %v1295_v41  ;;  %v1294_v43 = vsub.f32 2.0, %v1292_v29 }
 0xa59   :  { %v1300_v45 = vmul.f32 %v1297_v42, %v1265_v17  ;;  %v1296_v46 = vmul.f32 %v1754_v40, %v1294_v43 }
 0xa5b   :  { %v1308_v48 = vmul.f32 %v1344_v44, %v1300_v45  ;;  %v1299_v49 = vmul.f32 %v1296_v46, %v1264_v19 }
 0xa5d   :  { %v1317_v50 = vadd.f32 %v1345_v47, %v1308_v48  ;;  %v1307_v51 = vmul.f32 %v1344_v44, %v1299_v49 }
 0xa5f   :  { %1319 = vst [vmem:[#allocation13 + $0x8] sm:$0xff] %v1317_v50  ;;  %v1316_v53 = vadd.f32 %v1345_v47, %v1307_v51 }
 0xa61   :  { %1318 = vst [vmem:[#allocation13] sm:$0xff] %v1316_v53 }
 0xa62   :  { %1886 = shalt.err (!%p1883_p6)
}
 0xa63   :  { %1331 = dma.vmem_to_hbm [thread:$0]  %s1326_s16, 256, %s2125_s8, [#allocation4], %s1907_s10, %s1907_s10, %s1908_s11  }
 0xa64   :  { %1903 = dma.done.wait [#allocation4], 256  }
 0xa65   :  { %1904 = vsyncadd [#allocation4], 4294967040 }
 0xa66   :  { %1335 = vsyncpa [#allocation3], 1 }
 0xa67   :  { %1336 = vsyncpa [#allocation6], 1 }
 0xa68   :  { %1337 = vsyncpa [#allocation9], 1 }
 0xa69   :  { %1338 = vsyncpa [#allocation12], 1 }
 0xa6a   :  { %1339 = vsyncpa [#allocation4], 1 }

</bundles_post_ra>
